<compile_context>
chip_gen: v6e
topology: v6e:2x2x1
jax: 0.10.0
libtpu: 0.0.40
codegen_flags: <defaults>
</compile_context>

<pallas_src>
import functools
import math

import jax
import jax.numpy as jnp
from jax import lax
from jax.experimental import pallas as pl
from jax.experimental.pallas import tpu as pltpu


# ----------------------------------------------------------------------------
# Device-aware VMEM budget
# ----------------------------------------------------------------------------
@functools.lru_cache(maxsize=None)
def _vmem_limit_bytes():
    """~3/4 of physical VMEM, capped at 100 MiB (96 MiB on v5e/v6e, 48 MiB on
    v7x's 64 MiB).  Conservative 48 MiB fallback if the query is unavailable."""
    try:
        info = pltpu.get_tpu_info()
        cap = None
        for name in ("vmem_capacity_bytes", "vmem_bytes", "vmem_size_bytes"):
            cap = getattr(info, name, None)
            if cap:
                break
        if not cap:
            return 48 * 1024 * 1024
        return int(min(int(cap) * 3 // 4, 100 * 1024 * 1024))
    except Exception:
        return 48 * 1024 * 1024


def _pick_tile(dim, targets):
    """Largest target tile that divides dim, else the full dim."""
    for t in targets:
        if dim >= t and dim % t == 0:
            return t
    return dim


def _matmul_tiles(m, k, n, x_bytes, w_bytes, o_bytes, budget):
    """Tile sizes for the projection matmul.  tn is 128-aligned (or the full
    width), tk prefers >=256 (fills the MXU contraction depth), tm is shrunk
    until the double-buffered working set fits well under the VMEM budget."""
    tn = _pick_tile(n, (512, 384, 256, 128))           # 128-aligned or full
    tk = _pick_tile(k, (1024, 512, 256, 128))
    tm = _pick_tile(m, (1024, 512, 256, 128, 64, 32, 16, 8))

    def need(tm_):
        return (2 * (tm_ * tk * x_bytes + tk * tn * w_bytes + tm_ * tn * o_bytes)
                + tm_ * tn * 4)                        # + f32 accumulator

    while tm > 8 and tm % 2 == 0 and need(tm) > budget // 2:
        tm //= 2
    return tm, tk, tn


def _rows_tile(rows, hd, d_model, budget):
    """Row tile for the output-projection + LayerNorm kernel (W_o resident)."""
    tr = _pick_tile(rows, (1024, 512, 256, 128, 64, 32, 16, 8))

    def need(t):
        return (2 * (t * hd * 2 + t * d_model * 4 + t * d_model * 4)
                + 2 * (hd * d_model * 2 + 2 * d_model * 4))

    while tr > 8 and tr % 2 == 0 and need(tr) > budget // 2:
        tr //= 2
    return tr


# ----------------------------------------------------------------------------
# Kernel 1: tiled matmul (qkv_net, r_net projections) -- bf16 MXU, f32 acc
# ----------------------------------------------------------------------------
def _matmul_kernel(x_ref, w_ref, o_ref, acc_ref):
    @pl.when(pl.program_id(2) == 0)
    def _():
        acc_ref[...] = jnp.zeros_like(acc_ref)

    acc_ref[...] += jnp.dot(x_ref[...].astype(jnp.bfloat16),
                            w_ref[...].astype(jnp.bfloat16),
                            preferred_element_type=jnp.float32)

    @pl.when(pl.program_id(2) == pl.num_programs(2) - 1)
    def _():
        o_ref[...] = acc_ref[...].astype(o_ref.dtype)


def pallas_matmul(x, w, *, out_dtype, vmem_limit):
    m, k = x.shape
    k2, n = w.shape
    assert k == k2
    tm, tk, tn = _matmul_tiles(m, k, n, x.dtype.itemsize, w.dtype.itemsize,
                               jnp.dtype(out_dtype).itemsize, vmem_limit)
    grid = (m // tm, n // tn, k // tk)
    return pl.pallas_call(
        _matmul_kernel,
        out_shape=jax.ShapeDtypeStruct((m, n), out_dtype),
        grid=grid,
        in_specs=[
            pl.BlockSpec((tm, tk), lambda i, j, kk: (i, kk)),
            pl.BlockSpec((tk, tn), lambda i, j, kk: (kk, j)),
        ],
        out_specs=pl.BlockSpec((tm, tn), lambda i, j, kk: (i, j)),
        scratch_shapes=[pltpu.VMEM((tm, tn), jnp.float32)],
        compiler_params=pltpu.CompilerParams(
            dimension_semantics=("parallel", "parallel", "arbitrary"),
            vmem_limit_bytes=vmem_limit),
    )(x, w)


# ----------------------------------------------------------------------------
# Relative shift (exact PyTorch _rel_shift semantics, rlen == klen == qlen)
# ----------------------------------------------------------------------------
def _rel_shift_host(bd):
    """Exact _rel_shift on a 2-D (q, r) array using plain XLA ops (pad +
    reshape trick).  Used only to validate the in-kernel roll path."""
    q, r = bd.shape
    padded = jnp.concatenate([jnp.zeros((q, 1), bd.dtype), bd], axis=1)
    return padded.reshape(r + 1, q)[1:, :].reshape(q, r)


def _rel_shift_roll(bd, sign):
    """Rel-shift via ONE strided XLU rotate.

    d = [0 | bd_next | bd] has width 2r+1; rotating row i by (i+1) positions
    toward higher lane indices (numpy-roll convention) reproduces the exact
    PyTorch _rel_shift at every position.  `sign` flips shift/stride for the
    opposite rotate convention; the wrapper probes which one the backend
    implements and falls back to the select-based shifter otherwise."""
    q, r = bd.shape
    zero_col = jnp.zeros((q, 1), bd.dtype)
    bd_next = jnp.concatenate([bd[1:, :], jnp.zeros((1, r), bd.dtype)], axis=0)
    d = jnp.concatenate([zero_col, bd_next, bd], axis=1)       # (q, 2r+1)
    rolled = pltpu.roll(d, sign, 1, stride=sign, stride_axis=0)
    return rolled[:, :r]


def _rel_shift_select(bd, take_bits, shifts):
    """Fallback: exact log2(q)-deep barrel shifter (select/concat based)."""
    q, r = bd.shape
    zero_col = jnp.zeros((q, 1), bd.dtype)
    bd_next = jnp.concatenate([bd[1:, :], jnp.zeros((1, r), bd.dtype)], axis=0)
    c2 = jnp.concatenate([bd, zero_col, bd_next], axis=1)      # (q, 2r+1)
    for take, s in zip(take_bits, shifts):
        shifted = jnp.concatenate(
            [c2[:, s:], jnp.zeros((q, s), bd.dtype)], axis=1)
        c2 = jnp.where(take, shifted, c2)
    return c2[:, :r]


@functools.lru_cache(maxsize=None)
def _rel_shift_roll_sign(qlen, rlen):
    """Probe whether the strided pltpu.roll rel-shift is usable for this shape
    and with which sign convention.  Returns +1 / -1, or 0 => fallback."""
    if qlen <= 1:
        return 0
    bd = (jnp.arange(qlen * rlen, dtype=jnp.float32) + 1.0).reshape(qlen, rlen)
    expected = _rel_shift_host(bd)
    for sign in (1, -1):
        def kern(x_ref, o_ref, *, sign=sign):
            o_ref[...] = _rel_shift_roll(x_ref[...], sign)
        try:
            got = pl.pallas_call(
                kern,
                out_shape=jax.ShapeDtypeStruct((qlen, rlen), jnp.float32),
            )(bd)
            if bool(jnp.all(got == expected)):
                return sign
        except Exception:          # lowering not supported -> try next / fall back
            pass
    return 0


# ----------------------------------------------------------------------------
# Kernel 2: attention core, one program per batch, all heads in-program
# ----------------------------------------------------------------------------
def _attn_core_kernel(qkv_ref, rk_ref, rwb_ref, rrb_ref, o_ref, *,
                      n_head, d_head, qlen, klen, rlen, scale, causal,
                      roll_sign):
    hd = n_head * d_head
    qkv = qkv_ref[0]                       # (qlen, 3*hd), bf16
    rk = rk_ref[...]                       # (rlen, hd),  bf16
    rwb = rwb_ref[...]                     # (1, hd),     f32
    rrb = rrb_ref[...]                     # (1, hd),     f32

    # --- hoisted once, shared across heads ---
    if causal:
        masked = (lax.broadcasted_iota(jnp.int32, (qlen, klen), 1) >
                  lax.broadcasted_iota(jnp.int32, (qlen, klen), 0)
                  + (klen - qlen))
    if roll_sign == 0 and qlen > 1:        # fallback shifter row bits
        dist = (qlen - 1) - lax.broadcasted_iota(jnp.int32, (qlen, 1), 0)
        nbits = (qlen - 1).bit_length()
        shifts = [1 << b for b in range(nbits)]
        take_bits = [((dist >> b) & 1) == 1 for b in range(nbits)]

    dims = (((1,), (1,)), ((), ()))        # contract d_head, no batch dims
    head_out = []
    for h in range(n_head):                # static unroll over heads
        q_h = qkv[:, h * d_head:(h + 1) * d_head].astype(jnp.float32)
        k_h = qkv[:, hd + h * d_head:hd + (h + 1) * d_head]
        v_h = qkv[:, 2 * hd + h * d_head:2 * hd + (h + 1) * d_head]
        rk_h = rk[:, h * d_head:(h + 1) * d_head]

        # fold 1/sqrt(d_head) into the (small) query tensors; bf16 MXU operands
        rw_q = ((q_h + rwb[:, h * d_head:(h + 1) * d_head]) * scale
                ).astype(jnp.bfloat16)
        rr_q = ((q_h + rrb[:, h * d_head:(h + 1) * d_head]) * scale
                ).astype(jnp.bfloat16)

        ac = lax.dot_general(rw_q, k_h, dims,
                             preferred_element_type=jnp.float32)   # (q, klen)
        bd = lax.dot_general(rr_q, rk_h, dims,
                             preferred_element_type=jnp.float32)   # (q, rlen)
        if qlen > 1:
            if roll_sign != 0:
                bd = _rel_shift_roll(bd, roll_sign)                # 1 XLU pass
            else:
                bd = _rel_shift_select(bd, take_bits, shifts)      # fallback

        score = ac + bd[:, :klen]
        if causal:
            # finite mask value: no NaN even if a row were fully masked
            score = jnp.where(masked, jnp.float32(-1e30), score)

        m = jnp.max(score, axis=-1, keepdims=True)
        p = jnp.exp(score - m)
        denom = jnp.sum(p, axis=-1, keepdims=True)
        prob = (p * pl.reciprocal(denom, approx=True)).astype(jnp.bfloat16)
        head_out.append(jnp.dot(prob, v_h,
                                preferred_element_type=jnp.float32))

    # single lane-dense (qlen, n_head*d_head) store
    o_ref[0] = jnp.concatenate(head_out, axis=-1).astype(o_ref.dtype)
    # TODO(synk): for very long qlen on v7x (64 MiB VMEM), tile klen
    # flash-style with an online softmax and/or move heads into the grid.


# ----------------------------------------------------------------------------
# Kernel 3: output projection + residual + LayerNorm (post-norm), row-tiled
# ----------------------------------------------------------------------------
def _out_ln_kernel(av_ref, w_ref, wo_ref, g_ref, b_ref, o_ref, *, eps):
    attn_out = jnp.dot(av_ref[...], wo_ref[...],        # bf16 x bf16 -> f32
                       preferred_element_type=jnp.float32)
    x = w_ref[...] + attn_out                            # residual (f32)
    mu = jnp.mean(x, axis=-1, keepdims=True)
    xc = x - mu
    var = jnp.mean(xc * xc, axis=-1, keepdims=True)
    o_ref[...] = ((xc * lax.rsqrt(var + eps)) * g_ref[...]
                  + b_ref[...]).astype(o_ref.dtype)


# ----------------------------------------------------------------------------
# Wrapper
# ----------------------------------------------------------------------------
def rel_partial_mha_pallas(params, w, r, r_w_bias, r_r_bias, attn_mask=None,
                           *, n_head, d_head, ln_eps=1e-5):
    qlen, bsz, d_model = w.shape
    rlen = r.shape[0]
    klen = qlen                      # mems=None, past_key_values=None
    assert rlen == klen, "rlen must equal klen (rel-shift shape requirement)"
    hd = n_head * d_head
    scale = 1.0 / math.sqrt(d_head)
    causal = attn_mask is not None
    vmem_limit = _vmem_limit_bytes()
    # TODO(synk): only the standard 2-D causal mask (dim()==2 branch) is
    # supported (generated in-kernel); arbitrary/3-D masks, mems,
    # past_key_values, use_cache, pre_lnorm and primer_ez are not exercised.

    # single transpose to batch-major; downstream reshapes are free views.
    # TODO(synk): folding this transpose into the kernel BlockSpecs needs a
    # second-minor block of 1 over bsz, which the (8,128) tiling rule forbids.
    w_bm = jnp.transpose(w, (1, 0, 2)).reshape(bsz * qlen, d_model)

    # static weights in bf16 (halves their HBM reads; MXU runs bf16 anyway)
    w_qkv = params["W_qkv"].astype(jnp.bfloat16)
    w_r = params["W_r"].astype(jnp.bfloat16)
    w_o = params["W_o"].astype(jnp.bfloat16)

    # --- projections (tiled Pallas matmuls, bf16 intermediates) ---
    qkv = pallas_matmul(w_bm, w_qkv, out_dtype=jnp.bfloat16,
                        vmem_limit=vmem_limit)          # (bsz*qlen, 3*hd)
    r_head_k = pallas_matmul(r, w_r, out_dtype=jnp.bfloat16,
                             vmem_limit=vmem_limit)     # (rlen, hd)

    roll_sign = _rel_shift_roll_sign(qlen, rlen)        # 0 => select fallback

    qkv3 = qkv.reshape(bsz, qlen, 3 * hd)
    rwb = r_w_bias.reshape(1, hd).astype(jnp.float32)
    rrb = r_r_bias.reshape(1, hd).astype(jnp.float32)

    # --- attention core: grid over batch, lane-dense (qlen, hd) output ---
    attn_vec = pl.pallas_call(
        functools.partial(_attn_core_kernel, n_head=n_head, d_head=d_head,
                          qlen=qlen, klen=klen, rlen=rlen, scale=scale,
                          causal=causal, roll_sign=roll_sign),
        out_shape=jax.ShapeDtypeStruct((bsz, qlen, hd), jnp.bfloat16),
        grid=(bsz,),
        in_specs=[
            pl.BlockSpec((1, qlen, 3 * hd), lambda b: (b, 0, 0)),
            pl.BlockSpec((rlen, hd), lambda b: (0, 0)),
            pl.BlockSpec((1, hd), lambda b: (0, 0)),
            pl.BlockSpec((1, hd), lambda b: (0, 0)),
        ],
        out_specs=pl.BlockSpec((1, qlen, hd), lambda b: (b, 0, 0)),
        compiler_params=pltpu.CompilerParams(
            dimension_semantics=("parallel",),
            vmem_limit_bytes=vmem_limit),
    )(qkv3, r_head_k, rwb, rrb)

    # --- output projection + residual + LayerNorm, tiled over rows ---
    rows = bsz * qlen
    tr = _rows_tile(rows, hd, d_model, vmem_limit)
    out_bm = pl.pallas_call(
        functools.partial(_out_ln_kernel, eps=ln_eps),
        out_shape=jax.ShapeDtypeStruct((rows, d_model), jnp.float32),
        grid=(rows // tr,),
        in_specs=[
            pl.BlockSpec((tr, hd), lambda i: (i, 0)),
            pl.BlockSpec((tr, d_model), lambda i: (i, 0)),
            pl.BlockSpec((hd, d_model), lambda i: (0, 0)),
            pl.BlockSpec((1, d_model), lambda i: (0, 0)),
            pl.BlockSpec((1, d_model), lambda i: (0, 0)),
        ],
        out_specs=pl.BlockSpec((tr, d_model), lambda i: (i, 0)),
        compiler_params=pltpu.CompilerParams(
            dimension_semantics=("parallel",),
            vmem_limit_bytes=vmem_limit),
    )(attn_vec.reshape(rows, hd), w_bm, w_o,
      params["ln_g"].reshape(1, d_model), params["ln_b"].reshape(1, d_model))

    # back to the module's (qlen, bsz, d_model) layout
    return jnp.transpose(out_bm.reshape(bsz, qlen, d_model), (1, 0, 2))


# ----------------------------------------------------------------------------
# Pure-JAX reference (mirrors the PyTorch forward) for a sanity check
# ----------------------------------------------------------------------------
def _rel_shift_ref(x):
    b, n, q, r = x.shape
    zp = jnp.zeros((b, n, q, 1), x.dtype)
    xp = jnp.concatenate([zp, x], axis=3).reshape(b, n, r + 1, q)
    return xp[:, :, 1:, :].reshape(b, n, q, r)


def reference_forward(params, w, r, r_w_bias, r_r_bias, attn_mask, *,
                      n_head, d_head):
    qlen, bsz, d_model = w.shape
    rlen = r.shape[0]
    scale = 1.0 / math.sqrt(d_head)
    w_heads = w @ params["W_qkv"]
    r_head_k = (r @ params["W_r"]).reshape(rlen, n_head, d_head)
    hq, hk, hv = jnp.split(w_heads, 3, axis=-1)
    hq = hq.reshape(qlen, bsz, n_head, d_head)
    hk = hk.reshape(qlen, bsz, n_head, d_head)
    hv = hv.reshape(qlen, bsz, n_head, d_head)
    ac = jnp.einsum("ibnd,jbnd->bnij", hq + r_w_bias, hk)
    bd = _rel_shift_ref(jnp.einsum("ibnd,jnd->bnij", hq + r_r_bias, r_head_k))
    score = scale * (ac + bd)
    score = jnp.where(attn_mask[None, None], -jnp.inf, score)
    prob = jax.nn.softmax(score, axis=3)
    vec = jnp.einsum("bnij,jbnd->ibnd", prob, hv).reshape(qlen, bsz,
                                                          n_head * d_head)
    x = w + vec @ params["W_o"]
    mu = jnp.mean(x, axis=-1, keepdims=True)
    var = jnp.mean((x - mu) ** 2, axis=-1, keepdims=True)
    return (x - mu) / jnp.sqrt(var + 1e-5) * params["ln_g"] + params["ln_b"]


# ----------------------------------------------------------------------------
if __name__ == "__main__":
    n_head, d_head, d_model = 2, 16, 32
    qlen, bsz, rlen = 8, 2, 8

    key = jax.random.PRNGKey(0)
    ks = jax.random.split(key, 7)
    params = {
        "W_qkv": 0.02 * jax.random.normal(
            ks[0], (d_model, 3 * n_head * d_head), jnp.float32),
        "W_r": 0.02 * jax.random.normal(
            ks[1], (d_model, n_head * d_head), jnp.float32),
        "W_o": 0.02 * jax.random.normal(
            ks[2], (n_head * d_head, d_model), jnp.float32),
        "ln_g": jnp.ones((d_model,), jnp.float32),
        "ln_b": jnp.zeros((d_model,), jnp.float32),
    }
    w = jax.random.normal(ks[3], (qlen, bsz, d_model), jnp.float32)
    r = jax.random.normal(ks[4], (rlen, d_model), jnp.float32)
    r_w_bias = 0.02 * jax.random.normal(ks[5], (n_head, d_head), jnp.float32)
    r_r_bias = 0.02 * jax.random.normal(ks[6], (n_head, d_head), jnp.float32)
    # causal attention mask (dim()==2 branch of the PyTorch module)
    idx = jnp.arange(qlen)
    attn_mask = idx[None, :] > idx[:, None]

    out = rel_partial_mha_pallas(params, w, r, r_w_bias, r_r_bias, attn_mask,
                                 n_head=n_head, d_head=d_head)
    out = jax.block_until_ready(out)
    assert out.shape == (qlen, bsz, d_model)

    ref = reference_forward(params, w, r, r_w_bias, r_r_bias, attn_mask,
                            n_head=n_head, d_head=d_head)
    # tolerance covers bf16 MXU operands + approx reciprocal in the softmax
    if not bool(jnp.allclose(out, ref, atol=1e-2, rtol=1e-2)):
        raise SystemExit(f"mismatch vs reference, max abs diff "
                         f"{float(jnp.max(jnp.abs(out - ref)))}")
    print("KERNEL_OK")
</pallas_src>

<mosaic_0001>
module attributes {stable_mosaic.version = 11 : i64} {
  func.func @_matmul_kernel(%arg0: i32, %arg1: i32, %arg2: i32, %arg3: memref<16x32xf32, #tpu.memory_space<vmem>>, %arg4: memref<32x96xbf16, #tpu.memory_space<vmem>>, %arg5: memref<16x96xbf16, #tpu.memory_space<vmem>>, %arg6: memref<16x96xf32, #tpu.memory_space<vmem>>) attributes {dimension_semantics = [#tpu.dimension_semantics<parallel>, #tpu.dimension_semantics<parallel>, #tpu.dimension_semantics<arbitrary>], iteration_bounds = array<i64: 1, 1, 1>, scalar_prefetch = 0 : i64, scratch_operands = 1 : i64, tpu.core_type = #tpu.core_type<tc>, window_params = [{transform_indices = @transform_0, window_bounds = array<i64: 16, 32>}, {transform_indices = @transform_1, window_bounds = array<i64: 32, 96>}, {transform_indices = @transform_2, window_bounds = array<i64: 16, 96>}]} {
    %c0_i32 = arith.constant 0 : i32
    %0 = arith.cmpi eq, %arg2, %c0_i32 : i32
    %1 = arith.extui %0 : i1 to i32
    %c0_i32_0 = arith.constant 0 : i32
    %2 = arith.cmpi ne, %1, %c0_i32_0 : i32
    scf.if %2 {
      %cst_10 = arith.constant 0.000000e+00 : f32
      %13 = vector.broadcast %cst_10 : f32 to vector<16x96xf32>
      %c0_11 = arith.constant 0 : index
      %c0_12 = arith.constant 0 : index
      %14 = vector.load %arg6[%c0_11, %c0_12] : memref<16x96xf32, #tpu.memory_space<vmem>>, vector<16x96xf32>
      tpu.vector_store %arg6[%c0_11, %c0_12], %13 {strides = array<i32>} : memref<16x96xf32, #tpu.memory_space<vmem>>, vector<16x96xf32>,
    } else {
    }
    %c0 = arith.constant 0 : index
    %c0_1 = arith.constant 0 : index
    %3 = vector.load %arg6[%c0, %c0_1] : memref<16x96xf32, #tpu.memory_space<vmem>>, vector<16x96xf32>
    %c0_2 = arith.constant 0 : index
    %c0_3 = arith.constant 0 : index
    %4 = vector.load %arg3[%c0_2, %c0_3] : memref<16x32xf32, #tpu.memory_space<vmem>>, vector<16x32xf32>
    %5 = arith.truncf %4 : vector<16x32xf32> to vector<16x32xbf16>
    %c0_4 = arith.constant 0 : index
    %c0_5 = arith.constant 0 : index
    %6 = vector.load %arg4[%c0_4, %c0_5] : memref<32x96xbf16, #tpu.memory_space<vmem>>, vector<32x96xbf16>
    %cst = arith.constant dense<0.000000e+00> : vector<16x96xf32>
    %7 = tpu.matmul %5, %6, %cst {dimension_numbers = #tpu.dot_dimension_numbers<[1], [0], [0], [1], [0, 0, 1, 1], [], []>} : vector<16x32xbf16>, vector<32x96xbf16>, vector<16x96xf32> -> vector<16x96xf32>
    %8 = arith.addf %3, %7 : vector<16x96xf32>
    %c0_6 = arith.constant 0 : index
    %c0_7 = arith.constant 0 : index
    %9 = vector.load %arg6[%c0_6, %c0_7] : memref<16x96xf32, #tpu.memory_space<vmem>>, vector<16x96xf32>
    tpu.vector_store %arg6[%c0_6, %c0_7], %8 {strides = array<i32>} : memref<16x96xf32, #tpu.memory_space<vmem>>, vector<16x96xf32>,
    %c0_i32_8 = arith.constant 0 : i32
    %10 = arith.cmpi eq, %arg2, %c0_i32_8 : i32
    %11 = arith.extui %10 : i1 to i32
    %c0_i32_9 = arith.constant 0 : i32
    %12 = arith.cmpi ne, %11, %c0_i32_9 : i32
    scf.if %12 {
      %c0_10 = arith.constant 0 : index
      %c0_11 = arith.constant 0 : index
      %13 = vector.load %arg6[%c0_10, %c0_11] : memref<16x96xf32, #tpu.memory_space<vmem>>, vector<16x96xf32>
      %14 = arith.truncf %13 : vector<16x96xf32> to vector<16x96xbf16>
      %c0_12 = arith.constant 0 : index
      %c0_13 = arith.constant 0 : index
      %15 = vector.load %arg5[%c0_12, %c0_13] : memref<16x96xbf16, #tpu.memory_space<vmem>>, vector<16x96xbf16>
      tpu.vector_store %arg5[%c0_12, %c0_13], %14 {strides = array<i32>} : memref<16x96xbf16, #tpu.memory_space<vmem>>, vector<16x96xbf16>,
    } else {
    }
    return
  }
  func.func @transform_0(%arg0: i32, %arg1: i32, %arg2: i32) -> (i32, i32) {
    %c0_i32 = arith.constant 0 : i32
    return %arg0, %arg2 : i32, i32
  }
  func.func @transform_1(%arg0: i32, %arg1: i32, %arg2: i32) -> (i32, i32) {
    %c0_i32 = arith.constant 0 : i32
    return %arg2, %arg1 : i32, i32
  }
  func.func @transform_2(%arg0: i32, %arg1: i32, %arg2: i32) -> (i32, i32) {
    %c0_i32 = arith.constant 0 : i32
    return %arg0, %arg1 : i32, i32
  }
}

</mosaic_0001>

<bundles_post_ra>
// kernel: tpu_custom_call.1
= control target key start
LH: loop header
LB: loop body
LE: loop exit
PB: predicated region body
PF: predicated region fallthrough
CT: control target
= control target key end

     0   :  { %7 = vsyncpa [#allocation4], 0  ;;  %s291_s0 = inlined_call_operand.hbm [shape: f32[16,32], index: 0, kind: input, shape index: {}]   ;;  %s292_s1 = inlined_call_operand.hbm [shape: bf16[32,96], index: 1, kind: input, shape index: {}]   ;;  %s293_s2 = inlined_call_operand.hbm [shape: bf16[16,96], index: 2, kind: output, shape index: {}]  }
   0x1   :  { %8 = vsyncpa [#allocation7], 0 }
   0x2   :  { %9 = vsyncpa [#allocation5], 0  ;;  %s248_s9 = smov [#allocation3]  }
   0x3   :  { %s15_s10 = sshll.u32 %s248_s9, 4  ;;  %s16_s10 = int_to_ptr.vmem [resolvable:$true] %s15_s10 }
   0x4   :  { %s190_s11 = scalar_lea.vmem %s16_s10, 256  ;;  %p195_p1 = scmp.lt.s32.totalorder %s16_s10, %s16_s10 }
   0x5   :  { %p191_p0 = scmp.ne.s32.totalorder %s16_s10, %s190_s11  ;;  %p196_p2 = scmp.lt.s32.totalorder %s190_s11, %s190_s11 }
   0x7   :  { %p197_p3 = por %p196_p2, %p195_p1 }
   0x9   :  { %p198_p4 = pnand %p197_p3, %p191_p0 }
   0xb   :  { %201 = shalt.err (!%p198_p4)
}
   0xc   :  { %s249_s12 = smov 128   ;;  %s250_s13 = smov 8  }
   0xd   :  { %21 = dma.hbm_to_vmem [thread:$0]  %s291_s0, 256, %s16_s10, [#allocation4], %s249_s12, %s249_s12, %s250_s13  }
   0xe   :  { %s251_s16 = smov [#allocation6]  }
   0xf   :  { %s27_s17 = sshll.u32 %s251_s16, 4  ;;  %s28_s17 = int_to_ptr.vmem [resolvable:$true] %s27_s17 }
  0x10   :  { %s210_s18 = scalar_lea.vmem %s28_s17, 256  ;;  %p215_p6 = scmp.lt.s32.totalorder %s28_s17, %s28_s17 }
  0x11   :  { %p211_p5 = scmp.ne.s32.totalorder %s28_s17, %s210_s18  ;;  %p216_p7 = scmp.lt.s32.totalorder %s210_s18, %s210_s18 }
  0x13   :  { %p217_p8 = por %p216_p7, %p215_p6 }
  0x15   :  { %p218_p9 = pnand %p217_p8, %p211_p5 }
  0x17   :  { %221 = shalt.err (!%p218_p9)
}
  0x18   :  { %s252_s19 = smov 64   ;;  %s253_s20 = smov 4  }
  0x19   :  { %33 = dma.hbm_to_vmem [thread:$0]  %s292_s1, 256, %s28_s17, [#allocation7], %s252_s19, %s252_s19, %s253_s20  }
  0x1a   :  { %242 = dma.done.wait [#allocation4], 256  }
  0x1b   :  { %243 = vsyncadd [#allocation4], 4294967040 }
  0x1c   :  { %244 = dma.done.wait [#allocation7], 256  }
  0x1d   :  { %245 = vsyncadd [#allocation7], 4294967040  ;;  %vm45_vm0 = vcmask 785408   ;;  %v254_v0 = vmov 0.0   ;;  %vm255_vm1 = vmmov 0   ;;  %v180_v1 = vld [vmem:[#allocation6 + $0x8] sm:$0xff]  }
  0x1e   :  { %46 = vst.msk [vmem:[#allocation2] sm:$0xff] %vm45_vm0, %v254_v0  ;;  %47 = vst.msk [vmem:[#allocation2 + $0x8] sm:$0xff] %vm45_vm0, %v254_v0  ;;  %163 = vmatprep.subr.bf16.mxu0 %v254_v0  ;;  %167 = vmatprep.mubr.msk.bf16.mxu0 %vm255_vm1, %v254_v0  ;;  %v181_v2 = vld [vmem:[#allocation6] sm:$0xff]   ;;  %v50_v3 = vld [vmem:[#allocation3] sm:$0xff]  ;;  %vm69_vm2 = vcmask 261120   ;;  %vm132_vm3 = vcmask 781312  }
  0x1f   :  { %164 = vmatpush3.bf16.msra.mxu0 %v180_v1  ;;  %v51_v4 = vld [vmem:[#allocation3 + $0x8] sm:$0xff]  ;;  %s256_s0 = smov [#allocation8]  }
  0x20   :  { %165 = vmatprep.subr.bf16.mxu0 %v254_v0  ;;  %v52_v5 = vpack.c.bf16 %v51_v4, %v50_v3  ;;  %s140_s1 = sshll.u32 %s256_s0, 4  ;;  %s141_s1 = int_to_ptr.vmem [resolvable:$true] %s140_s1 }
  0x21   :  { %s222_s23 = scalar_lea.vmem %s141_s1, 128  ;;  %p227_p11 = scmp.lt.s32.totalorder %s141_s1, %s141_s1 }
  0x22   :  { %p223_p10 = scmp.ne.s32.totalorder %s141_s1, %s222_s23  ;;  %p228_p12 = scmp.lt.s32.totalorder %s222_s23, %s222_s23 }
  0x23   :  { %166 = vmatpush3.bf16.msra.mxu0 %v181_v2 }
  0x24   :  { %p229_p13 = por %p228_p12, %p227_p11 }
  0x25   :  { %v48_v6 = vld [vmem:[#allocation2] sm:$0xff]  ;;  %v49_v10 = vld [vmem:[#allocation2 + $0x8] sm:$0xff] }
  0x26   :  { %168 = vmatmul.mubr.msk.bf16.vlgmr.msra.gmra.mxu0 %vm69_vm2, %v52_v5  ;;  %p230_p0 = pnand %p229_p13, %p223_p10 }
  0xe6   :  { %v107_v7 = vpop.f32.mrf.mxu0 }
  0xe7   :  { %v114_v8 = vadd.f32 %v107_v7, %v48_v6 }
  0xe8   :  { %v169_v9 = vpop.f32.mrf.mxu0 }
  0xe9   :  { %117 = vst.msk [vmem:[#allocation2] sm:$0xff] %vm45_vm0, %v114_v8 }
  0xea   :  { %v110_v11 = vpop.f32.mrf.mxu0 }
  0xeb   :  { %v115_v12 = vadd.f32 %v110_v11, %v49_v10 }
  0xec   :  { %v170_v13 = vpop.f32.mrf.mxu0 }
  0xed   :  { %118 = vst.msk [vmem:[#allocation2 + $0x8] sm:$0xff] %vm45_vm0, %v115_v12 }
  0xf0   :  { %v122_v14 = vld [vmem:[#allocation2] sm:$0xff] }
  0xf1   :  { %v158_v15 = vpack.c.bf16 %v122_v14, %v122_v14 }
  0xf3   :  { %133 = vst.msk [vmem:[#allocation8] sm:$0xf] %vm132_vm3, %v158_v15 }
  0xf4   :  { %v123_v16 = vld [vmem:[#allocation2 + $0x8] sm:$0xff] }
  0xf5   :  { %v159_v17 = vpack.c.bf16 %v123_v16, %v123_v16 }
  0xf7   :  { %134 = vst.msk [vmem:[#allocation8 + $0x4] sm:$0xf] %vm132_vm3, %v159_v17 }
  0xf8   :  { %233 = shalt.err (!%p230_p0)
}
  0xf9   :  { %146 = dma.vmem_to_hbm [thread:$0]  %s141_s1, 128, %s293_s2, [#allocation5], %s252_s19, %s252_s19, %s253_s20  }
  0xfa   :  { %246 = dma.done.wait [#allocation5], 128  }
  0xfb   :  { %247 = vsyncadd [#allocation5], 4294967168 }
  0xfc   :  { %150 = vsyncpa [#allocation4], 1 }
  0xfd   :  { %151 = vsyncpa [#allocation7], 1 }
  0xfe   :  { %152 = vsyncpa [#allocation5], 1 }

</bundles_post_ra>
